<compile_context>
chip_gen: v7x
topology: tpu7x:2x2x1
jax: 0.10.0
libtpu: 0.0.40
codegen_flags: <defaults>
</compile_context>

<pallas_src>
import functools

import jax
import jax.numpy as jnp
from jax.experimental import pallas as pl
from jax.experimental.pallas import tpu as pltpu

_LANE = 128


def _rotary_packed_kernel(per, pattern_ref, lane_off_ref, out_ref):
    """Lane-dense path.

    Output slab is (total_rows, 128) where each packed row holds `per = 128/dim`
    consecutive positions.  For output element (r, c):
        position = r*per + c//dim        channel = c % dim
    pattern_ref  : (1, 128) f32  = tile(cat(inv_freq, inv_freq), per)
    lane_off_ref : (1, 128) f32  = lane // dim
    """
    block_rows, width = out_ref.shape
    row0 = pl.program_id(0) * block_rows                       # int32 scalar
    rows = jax.lax.broadcasted_iota(jnp.int32, (block_rows, width), 0) + row0
    pos = rows.astype(jnp.float32) * float(per) + lane_off_ref[...]
    out_ref[...] = pos * pattern_ref[...]


def _rotary_wide_kernel(inv_freq_cat_ref, out_ref):
    """General path: out tile is (block_s, dim); inv_freq_cat is (1, dim)."""
    block_s, dim = out_ref.shape
    row0 = pl.program_id(0) * block_s                          # int32 scalar
    t = (jax.lax.broadcasted_iota(jnp.int32, (block_s, dim), 0) + row0
         ).astype(jnp.float32)
    out_ref[...] = t * inv_freq_cat_ref[...]                   # outer product via VPU


def _pick_block_rows(total_rows: int, row_bytes: int,
                     target_bytes: int = 4 << 20) -> int:
    """~4 MiB output tiles (double-buffered -> 8 MiB VMEM), multiple of 8 when tiling."""
    block = min(total_rows, max(1, target_bytes // row_bytes))
    if block < total_rows:
        block = max(8, (block // 8) * 8)
    return block


def rotary_embedding(seq_len: int, dim: int, theta: float = 10000.0) -> jax.Array:
    """JAX/Pallas equivalent of RotaryEmbedding(dim, theta).forward(seq_len)."""
    assert dim % 2 == 0, "rotary dim must be even"

    # Deterministic "parameter", exactly as the PyTorch __init__ buffer.
    inv_freq = theta ** (-(jnp.arange(0, dim, 2, dtype=jnp.float32) / dim))  # (dim//2,)
    inv_freq_cat = jnp.concatenate([inv_freq, inv_freq])                     # (dim,)

    params = pltpu.CompilerParams(dimension_semantics=("parallel",))

    use_packed = (dim < _LANE) and (_LANE % dim == 0) and ((seq_len * dim) % _LANE == 0)

    if use_packed:
        per = _LANE // dim                         # positions packed per 128-lane row
        total_rows = (seq_len * dim) // _LANE
        pattern = jnp.tile(inv_freq_cat, per).reshape(1, _LANE)
        lane_off = (jnp.arange(_LANE, dtype=jnp.int32) // dim
                    ).astype(jnp.float32).reshape(1, _LANE)

        block_rows = _pick_block_rows(total_rows, _LANE * 4)
        grid = (pl.cdiv(total_rows, block_rows),)

        out = pl.pallas_call(
            functools.partial(_rotary_packed_kernel, per),
            out_shape=jax.ShapeDtypeStruct((total_rows, _LANE), jnp.float32),
            grid=grid,
            in_specs=[pl.BlockSpec((1, _LANE), lambda i: (0, 0)),
                      pl.BlockSpec((1, _LANE), lambda i: (0, 0))],
            out_specs=pl.BlockSpec((block_rows, _LANE), lambda i: (i, 0)),
            compiler_params=params,
        )(pattern, lane_off)
        # Row-major reshape back to the PyTorch layout; no data movement.
        return out.reshape(seq_len, dim)

    # General path (dim >= 128, or dim that doesn't tile the 128-lane axis).
    inv_freq_cat2d = inv_freq_cat.reshape(1, dim)
    block_s = _pick_block_rows(seq_len, dim * 4)
    grid = (pl.cdiv(seq_len, block_s),)

    out = pl.pallas_call(
        _rotary_wide_kernel,
        out_shape=jax.ShapeDtypeStruct((seq_len, dim), jnp.float32),
        grid=grid,
        in_specs=[pl.BlockSpec((1, dim), lambda i: (0, 0))],
        out_specs=pl.BlockSpec((block_s, dim), lambda i: (i, 0)),
        compiler_params=params,
    )(inv_freq_cat2d)
    return out


def rotary_embedding_ref(seq_len: int, dim: int, theta: float = 10000.0) -> jax.Array:
    """Pure-JAX reference for correctness checking."""
    inv_freq = theta ** (-(jnp.arange(0, dim, 2, dtype=jnp.float32) / dim))
    t = jnp.arange(seq_len, dtype=jnp.float32)
    freqs = jnp.einsum("i,j->ij", t, inv_freq)
    return jnp.concatenate([freqs, freqs], axis=-1)


if __name__ == "__main__":
    # PRNGKey created for protocol consistency; this module has no random inputs —
    # its only "parameter" is the deterministic inv_freq buffer.
    _ = jax.random.PRNGKey(0)

    # Small shapes consistent with the module: seq=8, rotary dim=32 (packed path).
    seq_len, dim = 8, 32
    out = jax.block_until_ready(rotary_embedding(seq_len, dim))
    ref = rotary_embedding_ref(seq_len, dim)
    assert out.shape == (seq_len, dim)
    assert out.dtype == jnp.float32
    assert jnp.allclose(out, ref, atol=1e-6, rtol=1e-6), "packed path mismatch"

    # Also exercise the wide (dim >= 128) path once, still small.
    out2 = jax.block_until_ready(rotary_embedding(16, 128))
    ref2 = rotary_embedding_ref(16, 128)
    assert jnp.allclose(out2, ref2, atol=1e-6, rtol=1e-6), "wide path mismatch"

    print("KERNEL_OK")
</pallas_src>

<mosaic_0001>
module attributes {stable_mosaic.version = 11 : i64} {
  func.func @_rotary_packed_kernel(%arg0: i32, %arg1: memref<1x128xf32, #tpu.memory_space<vmem>>, %arg2: memref<1x128xf32, #tpu.memory_space<vmem>>, %arg3: memref<2x128xf32, #tpu.memory_space<vmem>>) attributes {dimension_semantics = [#tpu.dimension_semantics<parallel>], iteration_bounds = array<i64: 1>, scalar_prefetch = 0 : i64, scratch_operands = 0 : i64, tpu.core_type = #tpu.core_type<tc>, window_params = [{pipeline_mode = #tpu.pipeline_mode<synchronous>, transform_indices = @transform_0, window_bounds = array<i64: 1, 128>}, {pipeline_mode = #tpu.pipeline_mode<synchronous>, transform_indices = @transform_1, window_bounds = array<i64: 1, 128>}, {transform_indices = @transform_2, window_bounds = array<i64: 2, 128>}]} {
    %c2_i32 = arith.constant 2 : i32
    %0 = arith.muli %arg0, %c2_i32 : i32
    %1 = tpu.iota {dimensions = array<i32: 0>} : vector<2x128xi32>
    %2 = vector.broadcast %0 : i32 to vector<2x128xi32>
    %3 = arith.addi %1, %2 : vector<2x128xi32>
    %4 = arith.sitofp %3 : vector<2x128xi32> to vector<2x128xf32>
    %cst = arith.constant 4.000000e+00 : f32
    %5 = vector.broadcast %cst : f32 to vector<2x128xf32>
    %6 = arith.mulf %4, %5 : vector<2x128xf32>
    %c0 = arith.constant 0 : index
    %c0_0 = arith.constant 0 : index
    %7 = vector.load %arg2[%c0, %c0_0] : memref<1x128xf32, #tpu.memory_space<vmem>>, vector<1x128xf32>
    %8 = vector.broadcast %7 : vector<1x128xf32> to vector<2x128xf32>
    %9 = arith.addf %6, %8 : vector<2x128xf32>
    %c0_1 = arith.constant 0 : index
    %c0_2 = arith.constant 0 : index
    %10 = vector.load %arg1[%c0_1, %c0_2] : memref<1x128xf32, #tpu.memory_space<vmem>>, vector<1x128xf32>
    %11 = vector.broadcast %10 : vector<1x128xf32> to vector<2x128xf32>
    %12 = arith.mulf %9, %11 : vector<2x128xf32>
    %c0_3 = arith.constant 0 : index
    %c0_4 = arith.constant 0 : index
    %13 = vector.load %arg3[%c0_3, %c0_4] : memref<2x128xf32, #tpu.memory_space<vmem>>, vector<2x128xf32>
    tpu.vector_store %arg3[%c0_3, %c0_4], %12 {strides = array<i32>} : memref<2x128xf32, #tpu.memory_space<vmem>>, vector<2x128xf32>,
    return
  }
  func.func @transform_0(%arg0: i32) -> (i32, i32) {
    %c0_i32 = arith.constant 0 : i32
    %c0_i32_0 = arith.constant 0 : i32
    %c0_i32_1 = arith.constant 0 : i32
    return %c0_i32, %c0_i32_0 : i32, i32
  }
  func.func @transform_1(%arg0: i32) -> (i32, i32) {
    %c0_i32 = arith.constant 0 : i32
    %c0_i32_0 = arith.constant 0 : i32
    %c0_i32_1 = arith.constant 0 : i32
    return %c0_i32, %c0_i32_0 : i32, i32
  }
  func.func @transform_2(%arg0: i32) -> (i32, i32) {
    %c0_i32 = arith.constant 0 : i32
    %c0_i32_0 = arith.constant 0 : i32
    return %arg0, %c0_i32 : i32, i32
  }
}

</mosaic_0001>

<bundles_post_ra>
// kernel: tpu_custom_call.1
= control target key start
LH: loop header
LB: loop body
LE: loop exit
PB: predicated region body
PF: predicated region fallthrough
CT: control target
= control target key end

     0   :  { %7 = vsyncpa [#allocation3], 0  ;;  %s159_s0 = inlined_call_operand.hbm [shape: f32[1,128], index: 0, kind: input, shape index: {}]   ;;  %s160_s1 = inlined_call_operand.vmem [shape: f32[1,128], index: 1, kind: input, shape index: {}]   ;;  %s161_s2 = inlined_call_operand.hbm [shape: f32[2,128], index: 2, kind: output, shape index: {}]  }
   0x1   :  { %8 = vsyncpa [#allocation4], 0  ;;  %s115_s9 = smov [#allocation2]   ;;  %s67_s13 = scalar_lea.hbm %s159_s0, 16 }
   0x2   :  { %s15_s10 = sshll.u32 %s115_s9, 4  ;;  %p68_p0 = scmp.ne.s32.totalorder %s159_s0, %s67_s13  ;;  %s16_s10 = int_to_ptr.vmem [resolvable:$true] %s15_s10 }
   0x3   :  { %p71_p1 = scmp.lt.u32.totalorder %s67_s13, %s159_s0 }
   0x5   :  { %p73_p2 = pnand %p71_p1, %p68_p0 }
   0x7   :  { %76 = shalt.err (!%p73_p2)
}
   0x8   :  { %s77_s18 = scalar_lea.vmem %s16_s10, 16  ;;  %s81_s19 = scalar_lea.vmem %s16_s10, 32 }
   0x9   :  { %p78_p3 = scmp.ne.s32.totalorder %s16_s10, %s77_s18  ;;  %p82_p4 = scmp.lt.s32.totalorder %s16_s10, %s16_s10 }
   0xa   :  { %p83_p5 = scmp.lt.s32.totalorder %s81_s19, %s77_s18 }
   0xc   :  { %p84_p6 = por %p83_p5, %p82_p4 }
   0xe   :  { %p85_p7 = pnand %p84_p6, %p78_p3 }
  0x10   :  { %88 = shalt.err (!%p85_p7)
}
  0x11   :  { %18 = dma.hbm_to_vmem [thread:$0]  %s159_s0, 16, %s16_s10, [#allocation3]  }
  0x12   :  { %111 = dma.done.wait [#allocation3], 16  }
  0x13   :  { %112 = vsyncadd [#allocation3], 4294967280  ;;  %v25_v0 = vlaneseq  ;;  %v63_v4 = vld [vmem:[%s160_s1] ss:$0 sm:$0xff]  ;;  %s116_s24 = smov [#allocation5]  }
  0x14   :  { %v64_v5 = vld [vmem:[#allocation2] ss:$0 sm:$0xff]  ;;  %s54_s25 = sshll.u32 %s116_s24, 4  ;;  %s55_s25 = int_to_ptr.vmem [resolvable:$true] %s54_s25 }
  0x15   :  { %v26_v1 = vshrl.u32 %v25_v0, 7  ;;  %s89_s26 = scalar_lea.vmem %s55_s25, 32  ;;  %p94_p9 = scmp.lt.s32.totalorder %s55_s25, %s55_s25 }
  0x16   :  { %p90_p8 = scmp.ne.s32.totalorder %s55_s25, %s89_s26  ;;  %p95_p10 = scmp.lt.s32.totalorder %s89_s26, %s89_s26 }
  0x17   :  { %v29_v2 = vcvt.s32.f32 %v26_v1 }
  0x18   :  { %p96_p11 = por %p95_p10, %p94_p9 }
  0x19   :  { %v30_v3 = vmul.f32 4.0, %v29_v2 }
  0x1a   :  { %p97_p12 = pnand %p96_p11, %p90_p8 }
  0x1b   :  { %v38_v6 = vadd.f32 %v63_v4, %v30_v3 }
  0x1d   :  { %v46_v7 = vmul.f32 %v64_v5, %v38_v6 }
  0x1f   :  { %47 = vst [vmem:[#allocation5] sm:$0x3] %v46_v7 }
  0x20   :  { %100 = shalt.err (!%p97_p12)
}
  0x21   :  { %s101_s28 = scalar_lea.hbm %s161_s2, 32 }
  0x22   :  { %p102_p13 = scmp.ne.s32.totalorder %s161_s2, %s101_s28  ;;  %p105_p0 = scmp.lt.u32.totalorder %s101_s28, %s161_s2 }
  0x24   :  { %p107_p1 = pnand %p105_p0, %p102_p13 }
  0x26   :  { %110 = shalt.err (!%p107_p1)
}
  0x27   :  { %57 = dma.vmem_to_hbm [thread:$0]  %s55_s25, 32, %s161_s2, [#allocation4]  }
  0x28   :  { %113 = dma.done.wait [#allocation4], 32  }
  0x29   :  { %114 = vsyncadd [#allocation4], 4294967264 }
  0x2a   :  { %61 = vsyncpa [#allocation3], 1 }
  0x2b   :  { %62 = vsyncpa [#allocation4], 1 }

</bundles_post_ra>
